<compile_context>
chip_gen: v7x
topology: tpu7x:2x2x1
jax: 0.10.0
libtpu: 0.0.40
codegen_flags: <defaults>
</compile_context>

<pallas_src>
import functools

import jax
import jax.numpy as jnp
from jax.experimental import pallas as pl
from jax.experimental.pallas import tpu as pltpu

_MIB = 1024 * 1024


def _round_up(x, m):
    return ((x + m - 1) // m) * m


def _sublane_align(dtype):
    # min second-to-last tile dim: 8 for 4-byte, 16 for 2-byte, 32 for 1-byte
    return {4: 8, 2: 16, 1: 32}.get(jnp.dtype(dtype).itemsize, 8)


def _chip_generation():
    try:
        kind = jax.devices()[0].device_kind.lower()
    except Exception:
        return "unknown"
    if "v5 lite" in kind or "v5e" in kind or "v5litepod" in kind:
        return "v5e"
    if "v6" in kind or "trillium" in kind:
        return "v6e"
    if "v7" in kind:
        return "v7x"
    return "unknown"


def _default_tiles(gen, compute_itemsize):
    half = compute_itemsize <= 2
    if gen == "v5e":
        # 512x512 is already compute-bound; bigger K tile halves acc RMW traffic.
        return 512, 512, 1024
    if gen == "v6e":
        # Need ~650 flop/byte for bf16; 1024x1024 output tile gives 512.
        return (1024, 1024, 512) if half else (512, 512, 512)
    if gen == "v7x":
        # Need ~311 flop/byte; 1024x512 gives ~341 and stays well inside VMEM.
        return (1024, 512, 512) if half else (512, 512, 512)
    return 512, 512, 512


def _pick_tile_padded(dim, align, max_tile):
    """Tile a dim that we are allowed to zero-pad.

    Pads only to `align` when possible; otherwise picks the tile (multiple of
    `align`, <= max_tile) that minimizes total padded size first and grid steps
    second.  Returns (padded_dim, tile) with padded_dim % tile == 0.
    """
    max_tile = max(align, (max_tile // align) * align)
    d_aligned = _round_up(dim, align)
    if d_aligned <= max_tile:
        return d_aligned, d_aligned
    best_padded = best_steps = best_tile = None
    for tile in range(align, max_tile + 1, align):
        padded = _round_up(dim, tile)
        steps = padded // tile
        if best_padded is None or (padded, steps) < (best_padded, best_steps):
            best_padded, best_steps, best_tile = padded, steps, tile
    return best_padded, best_tile


def _pick_tile_divisor(dim, align, max_tile):
    """Largest tile (multiple of align, <= max_tile) that divides `dim`."""
    max_tile = max(align, (max_tile // align) * align)
    if dim <= max_tile:
        return dim
    best = align
    for tile in range(align, max_tile + 1, align):
        if dim % tile == 0:
            best = tile
    return best


# ---------------------------------------------------------------------------
# Kernels
# ---------------------------------------------------------------------------

def _linear_acc_kernel(x_ref, w_ref, b_ref, o_ref, acc_ref):
    # x_ref: (tm, tk), w_ref: (tk, tn), b_ref: (1, tn), o_ref/acc_ref: (tm, tn)
    k = pl.program_id(2)
    part = jnp.dot(x_ref[...], w_ref[...], preferred_element_type=jnp.float32)

    @pl.when(k == 0)
    def _init():
        # Initialize with dot + bias: no zero fill, no finalize add.
        acc_ref[...] = part + b_ref[...].astype(jnp.float32)

    @pl.when(k > 0)
    def _accum():
        acc_ref[...] += part

    @pl.when(k == pl.num_programs(2) - 1)
    def _finalize():
        o_ref[...] = acc_ref[...].astype(o_ref.dtype)


def _linear_single_kernel(x_ref, w_ref, b_ref, o_ref):
    # Whole K in one tile: no accumulator, direct store.
    o_ref[...] = (
        jnp.dot(x_ref[...], w_ref[...], preferred_element_type=jnp.float32)
        + b_ref[...].astype(jnp.float32)
    ).astype(o_ref.dtype)


# ---------------------------------------------------------------------------
# Wrapper
# ---------------------------------------------------------------------------

def pack_linear_weight(weight, compute_dtype=None):
    """One-time packing of the PyTorch-layout weight (fan_out, fan_in):
    pad fan_in/fan_out to multiples of 128 and transpose to (fan_in, fan_out)
    (MXU-natural).  Do this at init, NOT per forward call."""
    fan_out, fan_in = weight.shape
    k_pad = _round_up(fan_in, 128)
    n_pad = _round_up(fan_out, 128)
    w = weight if compute_dtype is None else weight.astype(compute_dtype)
    if (n_pad, k_pad) != (fan_out, fan_in):
        w = jnp.pad(w, ((0, n_pad - fan_out), (0, k_pad - fan_in)))
    return jnp.asarray(w.T)  # (k_pad, n_pad)


@functools.partial(
    jax.jit,
    static_argnames=("tile_m", "tile_n", "tile_k", "compute_dtype",
                     "single_k_budget_bytes"))
def linear_forward(x, w_packed, bias, *, tile_m=None, tile_n=None, tile_k=None,
                   compute_dtype=None, single_k_budget_bytes=24 * _MIB):
    """y = x @ W.T + b.

    x:        (..., fan_in)
    w_packed: (k_pad, n_pad) from pack_linear_weight(weight)
    bias:     (fan_out,)
    """
    k_pad, n_pad = w_packed.shape
    fan_out = bias.shape[0]
    lead = x.shape[:-1]
    fan_in = x.shape[-1]
    out_dtype = x.dtype

    x2d = x.reshape(-1, fan_in)
    if compute_dtype is not None and x2d.dtype != jnp.dtype(compute_dtype):
        x2d = x2d.astype(compute_dtype)
    m = x2d.shape[0]

    xb = jnp.dtype(x2d.dtype).itemsize
    wb = jnp.dtype(w_packed.dtype).itemsize
    ob = jnp.dtype(out_dtype).itemsize

    gen = _chip_generation()
    dm, dn, dk = _default_tiles(gen, min(xb, wb))
    tile_m = dm if tile_m is None else tile_m
    tile_n = dn if tile_n is None else tile_n
    tile_k = dk if tile_k is None else tile_k

    sub = _sublane_align(x2d.dtype)
    m_pad, tm = _pick_tile_padded(m, sub, tile_m)
    tn = _pick_tile_divisor(n_pad, 128, tile_n)

    # v7x shards the parallel grid axes across 2 TensorCores: make sure there
    # are at least 2 parallel blocks so half the chip isn't idle.
    if gen == "v7x" and (m_pad // tm) * (n_pad // tn) < 2:
        if tn % 256 == 0:
            tn //= 2
        elif tm >= 2 * sub and tm % (2 * sub) == 0:
            tm //= 2

    # Single-K fast path: whole K in one block, no accumulator / K grid axis.
    # The weight block index is constant along the inner m axis, so the weight
    # stays VMEM-resident and is streamed from HBM exactly once per n-tile.
    single_vmem = 2 * (tm * k_pad * xb + k_pad * tn * wb
                       + tm * tn * ob + tn * 4)
    use_single_k = single_vmem <= single_k_budget_bytes
    tk = k_pad if use_single_k else _pick_tile_divisor(k_pad, 128, tile_k)

    # Per-call padding of activations only (weight padded once at pack time;
    # bias pad is negligible).
    if (m_pad, k_pad) != (m, fan_in):
        x2d = jnp.pad(x2d, ((0, m_pad - m), (0, k_pad - fan_in)))
    b2d = bias.reshape(1, fan_out).astype(jnp.float32)
    if n_pad != fan_out:
        b2d = jnp.pad(b2d, ((0, 0), (0, n_pad - fan_out)))

    n_steps, m_steps, k_steps = n_pad // tn, m_pad // tm, k_pad // tk

    cost = pl.CostEstimate(
        flops=2 * m_pad * k_pad * n_pad,
        transcendentals=0,
        bytes_accessed=(m_pad * k_pad * xb + n_pad * k_pad * wb
                        + n_pad * 4 + m_pad * n_pad * ob))

    if use_single_k:
        vmem_need = single_vmem
        grid_spec = pltpu.PrefetchScalarGridSpec(
            num_scalar_prefetch=0,
            grid=(n_steps, m_steps),
            in_specs=[
                pl.BlockSpec((tm, k_pad), lambda n, mi: (mi, 0)),   # x
                pl.BlockSpec((k_pad, tn), lambda n, mi: (0, n)),    # weight
                pl.BlockSpec((1, tn), lambda n, mi: (0, n)),        # bias
            ],
            out_specs=pl.BlockSpec((tm, tn), lambda n, mi: (mi, n)),
        )
        kernel = _linear_single_kernel
        dims = ("parallel", "parallel")
    else:
        vmem_need = (2 * (tm * tk * xb + tk * tn * wb + tn * 4 + tm * tn * ob)
                     + tm * tn * 4)
        grid_spec = pltpu.PrefetchScalarGridSpec(
            num_scalar_prefetch=0,
            grid=(n_steps, m_steps, k_steps),
            in_specs=[
                pl.BlockSpec((tm, tk), lambda n, mi, k: (mi, k)),   # x
                pl.BlockSpec((tk, tn), lambda n, mi, k: (k, n)),    # weight
                pl.BlockSpec((1, tn), lambda n, mi, k: (0, n)),     # bias
            ],
            out_specs=pl.BlockSpec((tm, tn), lambda n, mi, k: (mi, n)),
            scratch_shapes=[pltpu.VMEM((tm, tn), jnp.float32)],
        )
        kernel = _linear_acc_kernel
        dims = ("parallel", "parallel", "arbitrary")

    cap = 48 * _MIB if gen == "v7x" else 96 * _MIB
    vmem_limit = int(min(cap, max(32 * _MIB, vmem_need + 8 * _MIB)))

    out = pl.pallas_call(
        kernel,
        out_shape=jax.ShapeDtypeStruct((m_pad, n_pad), out_dtype),
        grid_spec=grid_spec,
        compiler_params=pltpu.CompilerParams(
            dimension_semantics=dims,
            vmem_limit_bytes=vmem_limit),
        cost_estimate=cost,
    )(x2d, w_packed, b2d)

    out = out[:m, :fan_out]
    return out.reshape(*lead, fan_out)


def init_linear_params(key, fan_in, fan_out, dtype=jnp.float32):
    # nn.init.xavier_uniform_: U(-a, a), a = sqrt(6 / (fan_in + fan_out))
    bound = (6.0 / (fan_in + fan_out)) ** 0.5
    weight = jax.random.uniform(
        key, (fan_out, fan_in), dtype=dtype, minval=-bound, maxval=bound)
    bias = jnp.zeros((fan_out,), dtype=dtype)
    return weight, bias


if __name__ == "__main__":
    # --- small demo matching the module (batch=2, seq=8, fan_in=32, fan_out=16)
    fan_in, fan_out = 32, 16
    batch, seq = 2, 8

    key = jax.random.PRNGKey(0)
    k_w, k_x, k_w2, k_x2, k_w3, k_x3 = jax.random.split(key, 6)

    weight, bias = init_linear_params(k_w, fan_in, fan_out)
    w_packed = pack_linear_weight(weight)          # one-time pack
    x = jax.random.normal(k_x, (batch, seq, fan_in), dtype=jnp.float32)

    y = jax.block_until_ready(linear_forward(x, w_packed, bias))
    y_ref = x @ weight.T + bias
    assert y.shape == (batch, seq, fan_out)
    assert jnp.allclose(y, y_ref, atol=1e-4, rtol=1e-4)

    # --- multi-tile accumulator path (M/N/K tiling, f32 accumulator, odd M) ---
    fi2, fo2, m2 = 512, 256, 72
    w2, b2 = init_linear_params(k_w2, fi2, fo2)
    b2 = b2 + 0.5
    wp2 = pack_linear_weight(w2)
    x2 = jax.random.normal(k_x2, (m2, fi2), dtype=jnp.float32)
    y2 = jax.block_until_ready(
        linear_forward(x2, wp2, b2, tile_m=32, tile_n=128, tile_k=256,
                       single_k_budget_bytes=0))   # force K-tiled path
    y2_ref = x2 @ w2.T + b2
    assert y2.shape == (m2, fo2)
    assert jnp.allclose(y2, y2_ref, atol=5e-4, rtol=5e-4)

    # --- bf16 compute path (f32 params/activations, bf16 MXU, f32 accum) ---
    fi3, fo3, m3 = 384, 256, 128
    w3, b3 = init_linear_params(k_w3, fi3, fo3)
    wp3 = pack_linear_weight(w3, compute_dtype=jnp.bfloat16)
    x3 = jax.random.normal(k_x3, (m3, fi3), dtype=jnp.float32)
    y3 = jax.block_until_ready(
        linear_forward(x3, wp3, b3, compute_dtype=jnp.bfloat16))
    y3_ref = x3 @ w3.T + b3
    assert y3.shape == (m3, fo3)
    assert jnp.allclose(y3, y3_ref, atol=5e-2, rtol=5e-2)

    print("KERNEL_OK")
</pallas_src>

<mosaic_0001>
module attributes {stable_mosaic.version = 11 : i64} {
  func.func @_linear_single_kernel(%arg0: i32, %arg1: i32, %arg2: memref<16x128xf32, #tpu.memory_space<vmem>>, %arg3: memref<128x128xf32, #tpu.memory_space<vmem>>, %arg4: memref<1x128xf32, #tpu.memory_space<vmem>>, %arg5: memref<16x128xf32, #tpu.memory_space<vmem>>) attributes {dimension_semantics = [#tpu.dimension_semantics<parallel>, #tpu.dimension_semantics<parallel>], iteration_bounds = array<i64: 1, 1>, scalar_prefetch = 0 : i64, scratch_operands = 0 : i64, tpu.core_type = #tpu.core_type<tc>, window_params = [{transform_indices = @transform_0, window_bounds = array<i64: 16, 128>}, {transform_indices = @transform_1, window_bounds = array<i64: 128, 128>}, {transform_indices = @transform_2, window_bounds = array<i64: 1, 128>}, {transform_indices = @transform_3, window_bounds = array<i64: 16, 128>}]} {
    %c0 = arith.constant 0 : index
    %c0_0 = arith.constant 0 : index
    %0 = vector.load %arg2[%c0, %c0_0] : memref<16x128xf32, #tpu.memory_space<vmem>>, vector<16x128xf32>
    %c0_1 = arith.constant 0 : index
    %c0_2 = arith.constant 0 : index
    %1 = vector.load %arg3[%c0_1, %c0_2] : memref<128x128xf32, #tpu.memory_space<vmem>>, vector<128x128xf32>
    %cst = arith.constant dense<0.000000e+00> : vector<16x128xf32>
    %2 = tpu.matmul %0, %1, %cst {dimension_numbers = #tpu.dot_dimension_numbers<[1], [0], [0], [1], [0, 0, 1, 1], [], []>} : vector<16x128xf32>, vector<128x128xf32>, vector<16x128xf32> -> vector<16x128xf32>
    %c0_3 = arith.constant 0 : index
    %c0_4 = arith.constant 0 : index
    %3 = vector.load %arg4[%c0_3, %c0_4] : memref<1x128xf32, #tpu.memory_space<vmem>>, vector<1x128xf32>
    %4 = vector.broadcast %3 : vector<1x128xf32> to vector<16x128xf32>
    %5 = arith.addf %2, %4 : vector<16x128xf32>
    %c0_5 = arith.constant 0 : index
    %c0_6 = arith.constant 0 : index
    %6 = vector.load %arg5[%c0_5, %c0_6] : memref<16x128xf32, #tpu.memory_space<vmem>>, vector<16x128xf32>
    tpu.vector_store %arg5[%c0_5, %c0_6], %5 {strides = array<i32>} : memref<16x128xf32, #tpu.memory_space<vmem>>, vector<16x128xf32>,
    return
  }
  func.func @transform_0(%arg0: i32, %arg1: i32) -> (i32, i32) {
    %c0_i32 = arith.constant 0 : i32
    %c0_i32_0 = arith.constant 0 : i32
    return %arg1, %c0_i32 : i32, i32
  }
  func.func @transform_1(%arg0: i32, %arg1: i32) -> (i32, i32) {
    %c0_i32 = arith.constant 0 : i32
    %c0_i32_0 = arith.constant 0 : i32
    return %c0_i32, %arg0 : i32, i32
  }
  func.func @transform_2(%arg0: i32, %arg1: i32) -> (i32, i32) {
    %c0_i32 = arith.constant 0 : i32
    %c0_i32_0 = arith.constant 0 : i32
    return %c0_i32, %arg0 : i32, i32
  }
  func.func @transform_3(%arg0: i32, %arg1: i32) -> (i32, i32) {
    %c0_i32 = arith.constant 0 : i32
    return %arg1, %arg0 : i32, i32
  }
}

</mosaic_0001>

<bundles_post_ra>
// kernel: linear_forward.1
= control target key start
LH: loop header
LB: loop body
LE: loop exit
PB: predicated region body
PF: predicated region fallthrough
CT: control target
= control target key end

     0   :  { %8 = vsyncpa [#allocation3], 0  ;;  %s248_s12 = smov [#allocation2]   ;;  %s298_s0 = inlined_call_operand.vmem [shape: f32[16,128], index: 0, kind: input, shape index: {}]   ;;  %s299_s1 = inlined_call_operand.hbm [shape: f32[128,128], index: 1, kind: input, shape index: {}]   ;;  %s300_s2 = inlined_call_operand.vmem [shape: f32[1,128], index: 2, kind: input, shape index: {}]   ;;  %s301_s3 = inlined_call_operand.vmem [shape: f32[16,128], index: 3, kind: output, shape index: {}]  }
   0x1   :  { %s16_s13 = sshll.u32 %s248_s12, 4  ;;  %s224_s16 = scalar_lea.hbm %s299_s1, 2048  ;;  %s17_s13 = int_to_ptr.vmem [resolvable:$true] %s16_s13 }
   0x2   :  { %p225_p0 = scmp.ne.s32.totalorder %s299_s1, %s224_s16  ;;  %p228_p1 = scmp.lt.u32.totalorder %s224_s16, %s299_s1 }
   0x4   :  { %p230_p2 = pnand %p228_p1, %p225_p0 }
   0x6   :  { %233 = shalt.err (!%p230_p2)
}
   0x7   :  { %s234_s21 = scalar_lea.vmem %s17_s13, 2048  ;;  %p239_p4 = scmp.lt.s32.totalorder %s17_s13, %s17_s13 }
   0x8   :  { %p235_p3 = scmp.ne.s32.totalorder %s17_s13, %s234_s21  ;;  %p240_p5 = scmp.lt.s32.totalorder %s234_s21, %s234_s21 }
   0xa   :  { %p241_p6 = por %p240_p5, %p239_p4 }
   0xc   :  { %p242_p7 = pnand %p241_p6, %p235_p3 }
   0xe   :  { %245 = shalt.err (!%p242_p7)
}
   0xf   :  { %s249_s22 = smov 128   ;;  %s250_s23 = smov 8  }
  0x10   :  { %22 = dma.hbm_to_vmem [thread:$0]  %s299_s1, 2048, %s17_s13, [#allocation3], %s249_s22, %s249_s22, %s250_s23  }
  0x11   :  { %246 = dma.done.wait [#allocation3], 2048  }
  0x12   :  { %247 = vsyncadd [#allocation3], 4294965248  ;;  %v30_v0 = vld [vmem:[#allocation2] sm:$0xff]  ;;  %v31_v1 = vld [vmem:[#allocation2 + $0x8] sm:$0xff] }
  0x13   :  { %v32_v2 = vld [vmem:[#allocation2 + $0x10] sm:$0xff]  ;;  %v189_v3 = vpack.c.bf16 %v31_v1, %v30_v0  ;;  %v33_v4 = vld [vmem:[#allocation2 + $0x18] sm:$0xff]  ;;  %v34_v6 = vld [vmem:[#allocation2 + $0x20] sm:$0xff] }
  0x14   :  { %v193_v5 = vpack.c.bf16 %v33_v4, %v32_v2  ;;  %v35_v7 = vld [vmem:[#allocation2 + $0x28] sm:$0xff]  ;;  %v28_v9 = vld [vmem:[%s298_s0] sm:$0xff]  ;;  %v36_v10 = vld [vmem:[#allocation2 + $0x30] sm:$0xff] }
  0x15   :  { %190 = vmatprep.subr.bf16.mxu0 %v189_v3  ;;  %v197_v8 = vpack.c.bf16 %v35_v7, %v34_v6  ;;  %v37_v11 = vld [vmem:[#allocation2 + $0x38] sm:$0xff]  ;;  %186 = vmatprep.mubr.f32.mxu0 %v28_v9  ;;  %v38_v13 = vld [vmem:[#allocation2 + $0x40] sm:$0xff]  ;;  %v39_v14 = vld [vmem:[#allocation2 + $0x48] sm:$0xff] }
  0x16   :  { %192 = vmatpush3.bf16.msra.mxu0 %v189_v3  ;;  %v201_v12 = vpack.c.bf16 %v37_v11, %v36_v10  ;;  %v205_v15 = vpack.c.bf16 %v39_v14, %v38_v13  ;;  %v40_v16 = vld [vmem:[#allocation2 + $0x50] sm:$0xff]  ;;  %v41_v17 = vld [vmem:[#allocation2 + $0x58] sm:$0xff]  ;;  %v42_v19 = vld [vmem:[#allocation2 + $0x60] sm:$0xff] }
  0x17   :  { %194 = vmatprep.subr.bf16.mxu0 %v193_v5  ;;  %v209_v18 = vpack.c.bf16 %v41_v17, %v40_v16  ;;  %v43_v20 = vld [vmem:[#allocation2 + $0x68] sm:$0xff]  ;;  %v44_v22 = vld [vmem:[#allocation2 + $0x70] sm:$0xff]  ;;  %v45_v23 = vld [vmem:[#allocation2 + $0x78] sm:$0xff] }
  0x18   :  { %v213_v21 = vpack.c.bf16 %v43_v20, %v42_v19  ;;  %v217_v24 = vpack.c.bf16 %v45_v23, %v44_v22  ;;  %v29_v25 = vld [vmem:[%s298_s0 + $0x8] sm:$0xff]  ;;  %v135_v26 = vld [vmem:[%s300_s2] ss:$0 sm:$0xff] }
  0x1a   :  { %196 = vmatpush3.bf16.msra.mxu0 %v193_v5 }
  0x1b   :  { %198 = vmatprep.subr.bf16.mxu0 %v197_v8 }
  0x1e   :  { %200 = vmatpush3.bf16.msra.mxu0 %v197_v8 }
  0x1f   :  { %202 = vmatprep.subr.bf16.mxu0 %v201_v12 }
  0x22   :  { %204 = vmatpush3.bf16.msra.mxu0 %v201_v12 }
  0x23   :  { %206 = vmatprep.subr.bf16.mxu0 %v205_v15 }
  0x26   :  { %208 = vmatpush3.bf16.msra.mxu0 %v205_v15 }
  0x27   :  { %210 = vmatprep.subr.bf16.mxu0 %v209_v18 }
  0x2a   :  { %212 = vmatpush3.bf16.msra.mxu0 %v209_v18 }
  0x2b   :  { %214 = vmatprep.subr.bf16.mxu0 %v213_v21 }
  0x2e   :  { %216 = vmatpush3.bf16.msra.mxu0 %v213_v21 }
  0x2f   :  { %218 = vmatprep.subr.bf16.mxu0 %v217_v24 }
  0x32   :  { %220 = vmatpush3.bf16.msra.mxu0 %v217_v24 }
  0x35   :  { %187 = vmatmul.mubr.f32.vlgmr.msra.gmra.mrb[0].mxu0 %v29_v25 }
 0x108   :  { %v188_v27 = vpop.f32.mrb[0].mxu0 }
 0x109   :  { %v125_v28 = vadd.f32 %v188_v27, %v135_v26  ;;  %v119_v29 = vpop.f32.mrb[1].mxu0 }
 0x10a   :  { %v120_v30 = vadd.f32 %v135_v26, %v119_v29 }
 0x10b   :  { %129 = vst [vmem:[%s301_s3 + $0x8] sm:$0xff] %v125_v28 }
 0x10c   :  { %128 = vst [vmem:[%s301_s3] sm:$0xff] %v120_v30 }
 0x10d   :  { %134 = vsyncpa [#allocation3], 1 }

</bundles_post_ra>
